<compile_context>
chip_gen: v5e
topology: v5e:2x2
jax: 0.10.0
libtpu: 0.0.40
codegen_flags: <defaults>
</compile_context>

<pallas_src>
import math

import jax
import jax.numpy as jnp
from jax.experimental import pallas as pl
from jax.experimental.pallas import tpu as pltpu


# ----------------------------------------------------------------------------
# Kernels
# ----------------------------------------------------------------------------

def _linear_kernel(x_ref, w_ref, b_ref, o_ref, acc_ref):
    """y = x @ W_t + b, K-tiled with f32 accumulator.  grid = (M, N, K)."""
    k = pl.program_id(2)

    @pl.when(k == 0)
    def _():
        acc_ref[...] = jnp.zeros_like(acc_ref)

    acc_ref[...] += jnp.dot(x_ref[...], w_ref[...],
                            preferred_element_type=jnp.float32)

    @pl.when(k == pl.num_programs(2) - 1)
    def _():
        o_ref[...] = (acc_ref[...]
                      + b_ref[...].astype(jnp.float32)).astype(o_ref.dtype)


def _linear_stats_kernel(x_ref, w_ref, b_ref, o_ref, sum_ref, ssq_ref, acc_ref):
    """Same matmul, plus per-feature sum / sum-of-squares accumulated across
    batch tiles.  grid = (N, M, K): feature tile is outermost so the stats
    output block (index (0, j)) stays resident across the whole batch sweep."""
    i = pl.program_id(1)   # batch tile
    k = pl.program_id(2)   # K tile

    @pl.when(k == 0)
    def _():
        acc_ref[...] = jnp.zeros_like(acc_ref)

    @pl.when(jnp.logical_and(i == 0, k == 0))
    def _():
        sum_ref[...] = jnp.zeros_like(sum_ref)
        ssq_ref[...] = jnp.zeros_like(ssq_ref)

    acc_ref[...] += jnp.dot(x_ref[...], w_ref[...],
                            preferred_element_type=jnp.float32)

    @pl.when(k == pl.num_programs(2) - 1)
    def _():
        y = acc_ref[...] + b_ref[...].astype(jnp.float32)
        o_ref[...] = y.astype(o_ref.dtype)
        sum_ref[...] += jnp.sum(y, axis=0, keepdims=True)
        ssq_ref[...] += jnp.sum(y * y, axis=0, keepdims=True)


def _affine_kernel(y_ref, scale_ref, shift_ref, o_ref):
    """o = y * scale + shift   (scale/shift fold mean, rstd, gamma, beta)."""
    y = y_ref[...].astype(jnp.float32)
    o_ref[...] = (y * scale_ref[...] + shift_ref[...]).astype(o_ref.dtype)


# ----------------------------------------------------------------------------
# Wrapper
# ----------------------------------------------------------------------------

_VMEM_LIMIT = 48 * 1024 * 1024  # fits inside every generation's scoped VMEM


def _pick_tile(dim, preferred):
    """Tile = preferred if it divides dim, else collapse to the full dim
    (keeps the (8,128) BlockSpec constraint trivially satisfied)."""
    if dim <= preferred or dim % preferred != 0:
        return dim
    return preferred


def feature_extractor_forward(x, w_t, b, gamma=None, beta=None, *,
                              feat_type="ori", bn_eps=1e-5,
                              tile_m=256, tile_n=256, tile_k=512,
                              compute_dtype=None):
    """x: (B, D_in); w_t: (D_in, F) (pre-transposed Linear weight); b: (F,).

    gamma/beta: optional BatchNorm affine params (F,), default 1 / 0
    (PyTorch BatchNorm1d default init).  Returns (B, F).
    compute_dtype=jnp.bfloat16 runs the MXU in bf16 (f32 accumulation).
    """
    B, D_in = x.shape
    F = w_t.shape[1]
    out_dtype = x.dtype

    tm = _pick_tile(B, tile_m)
    tn = _pick_tile(F, tile_n)
    tk = _pick_tile(D_in, tile_k)
    nm, nn, nk = B // tm, F // tn, D_in // tk

    if compute_dtype is not None:
        x = x.astype(compute_dtype)
        w_t = w_t.astype(compute_dtype)
    b2 = b.reshape(1, F).astype(jnp.float32)

    cost = pl.CostEstimate(
        flops=2 * B * D_in * F,
        transcendentals=0,
        bytes_accessed=4 * (B * D_in + D_in * F + B * F + F),
    )

    if feat_type != "bn":
        # ---- 'ori' path: tiled Linear only ---------------------------------
        return pl.pallas_call(
            _linear_kernel,
            out_shape=jax.ShapeDtypeStruct((B, F), out_dtype),
            grid_spec=pltpu.PrefetchScalarGridSpec(
                num_scalar_prefetch=0,
                grid=(nm, nn, nk),
                in_specs=[
                    pl.BlockSpec((tm, tk), lambda i, j, k: (i, k)),   # x tile
                    pl.BlockSpec((tk, tn), lambda i, j, k: (k, j)),   # W_t tile
                    pl.BlockSpec((1, tn), lambda i, j, k: (0, j)),    # bias tile
                ],
                out_specs=pl.BlockSpec((tm, tn), lambda i, j, k: (i, j)),
                scratch_shapes=[pltpu.VMEM((tm, tn), jnp.float32)],
            ),
            compiler_params=pltpu.CompilerParams(
                dimension_semantics=("parallel", "parallel", "arbitrary"),
                vmem_limit_bytes=_VMEM_LIMIT),
            cost_estimate=cost,
        )(x, w_t, b2)

    # ---- 'bn' path ----------------------------------------------------------
    # Phase 1: matmul + bias, fused with per-feature sum / sum-of-squares
    # accumulation across batch tiles (feature axis outermost & parallel).
    y, s, ss = pl.pallas_call(
        _linear_stats_kernel,
        out_shape=(
            jax.ShapeDtypeStruct((B, F), jnp.float32),
            jax.ShapeDtypeStruct((1, F), jnp.float32),
            jax.ShapeDtypeStruct((1, F), jnp.float32),
        ),
        grid_spec=pltpu.PrefetchScalarGridSpec(
            num_scalar_prefetch=0,
            grid=(nn, nm, nk),                       # (feature, batch, K)
            in_specs=[
                pl.BlockSpec((tm, tk), lambda j, i, k: (i, k)),   # x tile
                pl.BlockSpec((tk, tn), lambda j, i, k: (k, j)),   # W_t tile
                pl.BlockSpec((1, tn), lambda j, i, k: (0, j)),    # bias tile
            ],
            out_specs=[
                pl.BlockSpec((tm, tn), lambda j, i, k: (i, j)),   # y
                pl.BlockSpec((1, tn), lambda j, i, k: (0, j)),    # sum (resident)
                pl.BlockSpec((1, tn), lambda j, i, k: (0, j)),    # sumsq (resident)
            ],
            scratch_shapes=[pltpu.VMEM((tm, tn), jnp.float32)],
        ),
        compiler_params=pltpu.CompilerParams(
            dimension_semantics=("parallel", "arbitrary", "arbitrary"),
            vmem_limit_bytes=_VMEM_LIMIT),
        cost_estimate=cost,
    )(x, w_t, b2)

    # Tiny per-feature glue (O(F) work): biased batch variance, then fold
    # mean / rstd / gamma / beta into a single scale + shift pair.
    mean = s / B
    var = jnp.maximum(ss / B - mean * mean, 0.0)
    rstd = jax.lax.rsqrt(var + bn_eps)
    g = (jnp.ones((1, F), jnp.float32) if gamma is None
         else gamma.reshape(1, F).astype(jnp.float32))
    bt = (jnp.zeros((1, F), jnp.float32) if beta is None
          else beta.reshape(1, F).astype(jnp.float32))
    scale = g * rstd
    shift = bt - mean * scale

    # Phase 2: y * scale + shift, fully parallel over batch/feature tiles.
    return pl.pallas_call(
        _affine_kernel,
        out_shape=jax.ShapeDtypeStruct((B, F), out_dtype),
        grid_spec=pltpu.PrefetchScalarGridSpec(
            num_scalar_prefetch=0,
            grid=(nm, nn),
            in_specs=[
                pl.BlockSpec((tm, tn), lambda i, j: (i, j)),
                pl.BlockSpec((1, tn), lambda i, j: (0, j)),
                pl.BlockSpec((1, tn), lambda i, j: (0, j)),
            ],
            out_specs=pl.BlockSpec((tm, tn), lambda i, j: (i, j)),
        ),
        compiler_params=pltpu.CompilerParams(
            dimension_semantics=("parallel", "parallel"),
            vmem_limit_bytes=_VMEM_LIMIT),
    )(y, scale, shift)


def init_feature_extractor_params(key, input_dim, feature_dim):
    """Mirror init_weights: xavier_normal_ weight (gain=1), zero bias."""
    std = math.sqrt(2.0 / (input_dim + feature_dim))
    w = jax.random.normal(key, (feature_dim, input_dim), jnp.float32) * std
    b = jnp.zeros((feature_dim,), jnp.float32)
    return w.T, b            # pre-transpose once, outside the kernel


# ----------------------------------------------------------------------------
# Smoke test
# ----------------------------------------------------------------------------

if __name__ == "__main__":
    key = jax.random.PRNGKey(0)
    k_x, k_w, k_g, k_b = jax.random.split(key, 4)

    B, input_dim, feature_dim = 8, 32, 256
    x = jax.random.normal(k_x, (B, input_dim), jnp.float32)
    w_t, bias = init_feature_extractor_params(k_w, input_dim, feature_dim)

    # default module config: type='ori' -> Linear only
    y = jax.block_until_ready(
        feature_extractor_forward(x, w_t, bias, feat_type="ori"))
    y_ref = x @ w_t + bias
    assert y.shape == (B, feature_dim)
    assert jnp.allclose(y, y_ref, atol=1e-4, rtol=1e-4)

    # 'bn' path: Linear + training-mode BatchNorm1d (gamma=1, beta=0 defaults)
    y_bn = jax.block_until_ready(
        feature_extractor_forward(x, w_t, bias, feat_type="bn"))
    mean_ref = y_ref.mean(axis=0, keepdims=True)
    var_ref = ((y_ref - mean_ref) ** 2).mean(axis=0, keepdims=True)
    y_bn_ref = (y_ref - mean_ref) / jnp.sqrt(var_ref + 1e-5)
    assert jnp.allclose(y_bn, y_bn_ref, atol=1e-3, rtol=1e-3)

    # 'bn' path with non-default affine params (BatchNorm1d affine=True)
    gamma = 1.0 + 0.02 * jax.random.normal(k_g, (feature_dim,), jnp.float32)
    beta = 0.1 * jax.random.normal(k_b, (feature_dim,), jnp.float32)
    y_bna = jax.block_until_ready(
        feature_extractor_forward(x, w_t, bias, gamma, beta, feat_type="bn"))
    y_bna_ref = y_bn_ref * gamma + beta
    assert jnp.allclose(y_bna, y_bna_ref, atol=1e-3, rtol=1e-3)

    # bf16 MXU fast path (v6e/v7x), f32 accumulation
    y_bf16 = jax.block_until_ready(
        feature_extractor_forward(x, w_t, bias, feat_type="ori",
                                  compute_dtype=jnp.bfloat16))
    assert jnp.allclose(y_bf16, y_ref, atol=5e-2, rtol=5e-2)

    print("KERNEL_OK")
</pallas_src>

<mosaic_0001>
module attributes {stable_mosaic.version = 11 : i64} {
  func.func @_linear_kernel(%arg0: i32, %arg1: i32, %arg2: i32, %arg3: memref<8x32xf32, #tpu.memory_space<vmem>>, %arg4: memref<32x256xf32, #tpu.memory_space<vmem>>, %arg5: memref<1x256xf32, #tpu.memory_space<vmem>>, %arg6: memref<8x256xf32, #tpu.memory_space<vmem>>, %arg7: memref<8x256xf32, #tpu.memory_space<vmem>>) attributes {dimension_semantics = [#tpu.dimension_semantics<parallel>, #tpu.dimension_semantics<parallel>, #tpu.dimension_semantics<arbitrary>], iteration_bounds = array<i64: 1, 1, 1>, scalar_prefetch = 0 : i64, scratch_operands = 1 : i64, tpu.core_type = #tpu.core_type<tc>, window_params = [{transform_indices = @transform_0, window_bounds = array<i64: 8, 32>}, {transform_indices = @transform_1, window_bounds = array<i64: 32, 256>}, {transform_indices = @transform_2, window_bounds = array<i64: 1, 256>}, {transform_indices = @transform_3, window_bounds = array<i64: 8, 256>}]} {
    %c0_i32 = arith.constant 0 : i32
    %0 = arith.cmpi eq, %arg2, %c0_i32 : i32
    %1 = arith.extui %0 : i1 to i32
    %c0_i32_0 = arith.constant 0 : i32
    %2 = arith.cmpi ne, %1, %c0_i32_0 : i32
    scf.if %2 {
      %cst_10 = arith.constant 0.000000e+00 : f32
      %12 = vector.broadcast %cst_10 : f32 to vector<8x256xf32>
      %c0_11 = arith.constant 0 : index
      %c0_12 = arith.constant 0 : index
      %13 = vector.load %arg7[%c0_11, %c0_12] : memref<8x256xf32, #tpu.memory_space<vmem>>, vector<8x256xf32>
      tpu.vector_store %arg7[%c0_11, %c0_12], %12 {strides = array<i32>} : memref<8x256xf32, #tpu.memory_space<vmem>>, vector<8x256xf32>,
    } else {
    }
    %c0 = arith.constant 0 : index
    %c0_1 = arith.constant 0 : index
    %3 = vector.load %arg7[%c0, %c0_1] : memref<8x256xf32, #tpu.memory_space<vmem>>, vector<8x256xf32>
    %c0_2 = arith.constant 0 : index
    %c0_3 = arith.constant 0 : index
    %4 = vector.load %arg3[%c0_2, %c0_3] : memref<8x32xf32, #tpu.memory_space<vmem>>, vector<8x32xf32>
    %c0_4 = arith.constant 0 : index
    %c0_5 = arith.constant 0 : index
    %5 = vector.load %arg4[%c0_4, %c0_5] : memref<32x256xf32, #tpu.memory_space<vmem>>, vector<32x256xf32>
    %cst = arith.constant dense<0.000000e+00> : vector<8x256xf32>
    %6 = tpu.matmul %4, %5, %cst {dimension_numbers = #tpu.dot_dimension_numbers<[1], [0], [0], [1], [0, 0, 1, 1], [], []>} : vector<8x32xf32>, vector<32x256xf32>, vector<8x256xf32> -> vector<8x256xf32>
    %7 = arith.addf %3, %6 : vector<8x256xf32>
    %c0_6 = arith.constant 0 : index
    %c0_7 = arith.constant 0 : index
    %8 = vector.load %arg7[%c0_6, %c0_7] : memref<8x256xf32, #tpu.memory_space<vmem>>, vector<8x256xf32>
    tpu.vector_store %arg7[%c0_6, %c0_7], %7 {strides = array<i32>} : memref<8x256xf32, #tpu.memory_space<vmem>>, vector<8x256xf32>,
    %c0_i32_8 = arith.constant 0 : i32
    %9 = arith.cmpi eq, %arg2, %c0_i32_8 : i32
    %10 = arith.extui %9 : i1 to i32
    %c0_i32_9 = arith.constant 0 : i32
    %11 = arith.cmpi ne, %10, %c0_i32_9 : i32
    scf.if %11 {
      %c0_10 = arith.constant 0 : index
      %c0_11 = arith.constant 0 : index
      %12 = vector.load %arg7[%c0_10, %c0_11] : memref<8x256xf32, #tpu.memory_space<vmem>>, vector<8x256xf32>
      %c0_12 = arith.constant 0 : index
      %c0_13 = arith.constant 0 : index
      %13 = vector.load %arg5[%c0_12, %c0_13] : memref<1x256xf32, #tpu.memory_space<vmem>>, vector<1x256xf32>
      %14 = vector.broadcast %13 : vector<1x256xf32> to vector<8x256xf32>
      %15 = arith.addf %12, %14 : vector<8x256xf32>
      %c0_14 = arith.constant 0 : index
      %c0_15 = arith.constant 0 : index
      %16 = vector.load %arg6[%c0_14, %c0_15] : memref<8x256xf32, #tpu.memory_space<vmem>>, vector<8x256xf32>
      tpu.vector_store %arg6[%c0_14, %c0_15], %15 {strides = array<i32>} : memref<8x256xf32, #tpu.memory_space<vmem>>, vector<8x256xf32>,
    } else {
    }
    return
  }
  func.func @transform_0(%arg0: i32, %arg1: i32, %arg2: i32) -> (i32, i32) {
    %c0_i32 = arith.constant 0 : i32
    return %arg0, %arg2 : i32, i32
  }
  func.func @transform_1(%arg0: i32, %arg1: i32, %arg2: i32) -> (i32, i32) {
    %c0_i32 = arith.constant 0 : i32
    return %arg2, %arg1 : i32, i32
  }
  func.func @transform_2(%arg0: i32, %arg1: i32, %arg2: i32) -> (i32, i32) {
    %c0_i32 = arith.constant 0 : i32
    %c0_i32_0 = arith.constant 0 : i32
    return %c0_i32, %arg1 : i32, i32
  }
  func.func @transform_3(%arg0: i32, %arg1: i32, %arg2: i32) -> (i32, i32) {
    %c0_i32 = arith.constant 0 : i32
    return %arg0, %arg1 : i32, i32
  }
}

</mosaic_0001>

<bundles_post_ra>
// kernel: tpu_custom_call.1
= control target key start
LH: loop header
LB: loop body
LE: loop exit
PB: predicated region body
PF: predicated region fallthrough
CT: control target
= control target key end

     0   :  { %8 = vsyncpa [#allocation4], 0  ;;  %s304_s0 = inlined_call_operand.hbm [shape: f32[8,32], index: 0, kind: input, shape index: {}]   ;;  %s305_s1 = inlined_call_operand.hbm [shape: f32[32,256], index: 1, kind: input, shape index: {}]   ;;  %s306_s2 = inlined_call_operand.hbm [shape: f32[1,256], index: 2, kind: input, shape index: {}]   ;;  %s307_s3 = inlined_call_operand.hbm [shape: f32[8,256], index: 3, kind: output, shape index: {}]  }
   0x1   :  { %9 = vsyncpa [#allocation7], 0  ;;  %s26_s14 = sshll.u32 %s305_s1, 4  ;;  %s27_s14 = int_to_ptr.hbm [resolvable:$true] %s26_s14 }
   0x2   :  { %10 = vsyncpa [#allocation5], 0  ;;  %s266_s15 = smov [#allocation6]   ;;  %s16_s19 = sshll.u32 %s304_s0, 4  ;;  %s17_s19 = int_to_ptr.hbm [resolvable:$true] %s16_s19 }
   0x3   :  { %s28_s16 = sshll.u32 %s266_s15, 4  ;;  %s267_s20 = smov 256   ;;  %s29_s16 = int_to_ptr.vmem [resolvable:$true] %s28_s16 }
   0x4   :  { %s268_s21 = smov 16   ;;  %s269_s22 = smov [#allocation3]  }
   0x5   :  { %34 = dma.hbm_to_vmem [thread:$0]  %s27_s14, 1024, %s29_s16, [#allocation7], %s267_s20, %s267_s20, %s268_s21  }
   0x6   :  { %s18_s23 = sshll.u32 %s269_s22, 4  ;;  %s40_s26 = sshll.u32 %s306_s2, 4  ;;  %s19_s23 = int_to_ptr.vmem [resolvable:$true] %s18_s23  ;;  %s41_s26 = int_to_ptr.hbm [resolvable:$true] %s40_s26 }
   0x7   :  { %21 = dma.hbm_to_vmem [thread:$0]  %s17_s19, 128, %s19_s23, [#allocation4]  }
   0x8   :  { %s270_s1 = smov [#allocation8]  }
   0x9   :  { %s42_s27 = sshll.u32 %s270_s1, 4  ;;  %s43_s27 = int_to_ptr.vmem [resolvable:$true] %s42_s27 }
   0xa   :  { %45 = dma.hbm_to_vmem [thread:$0]  %s41_s26, 32, %s43_s27, [#allocation7]  }
   0xb   :  { %260 = dma.done.wait [#allocation4], 128  }
   0xc   :  { %261 = vsyncadd [#allocation4], 4294967168 }
   0xd   :  { %262 = dma.done.wait [#allocation7], 1056  }
   0xe   :  { %263 = vsyncadd [#allocation7], 4294966240  ;;  %v73_v0 = vld [vmem:[#allocation6 + $0x30] sm:$0xff]  ;;  %v74_v1 = vld [vmem:[#allocation6 + $0x38] sm:$0xff]  ;;  %vm75_vm0 = vcmask 261120   ;;  %s271_s0 = smov [#allocation9]  }
   0xf   :  { %v71_v2 = vld [vmem:[#allocation6 + $0x20] sm:$0xff]  ;;  %91 = vmatpush.msra.mxu0 %v73_v0  ;;  %111 = vmatpush.msra.mxu1 %v74_v1  ;;  %v72_v3 = vld [vmem:[#allocation6 + $0x28] sm:$0xff]  ;;  %v69_v4 = vld [vmem:[#allocation6 + $0x10] sm:$0xff]  ;;  %s143_s2 = sshll.u32 %s271_s0, 4  ;;  %s145_s30 = sshll.u32 %s307_s3, 4  ;;  %s144_s2 = int_to_ptr.vmem [resolvable:$true] %s143_s2  ;;  %s146_s30 = int_to_ptr.hbm [resolvable:$true] %s145_s30 }
  0x10   :  { %v70_v5 = vld [vmem:[#allocation6 + $0x18] sm:$0xff]  ;;  %v67_v6 = vld [vmem:[#allocation6] sm:$0xff]  ;;  %v68_v7 = vld [vmem:[#allocation6 + $0x8] sm:$0xff] }
  0x11   :  { %92 = vmatpush.msra.mxu0 %v71_v2  ;;  %112 = vmatpush.msra.mxu1 %v72_v3  ;;  %v66_v8 = vld [vmem:[#allocation3] sm:$0xff]  ;;  %v128_v9 = vld [vmem:[#allocation8] sm:$0x3] }
  0x12   :  { %v130_v10 = vperm.slane %v128_v9, 0  ;;  %v131_v11 = vperm.slane %v128_v9, 1 }
  0x13   :  { %93 = vmatpush.msra.mxu0 %v69_v4  ;;  %113 = vmatpush.msra.mxu1 %v70_v5 }
  0x15   :  { %94 = vmatpush.msra.mxu0 %v67_v6  ;;  %114 = vmatpush.msra.mxu1 %v68_v7 }
  0x16   :  { %156 = vmatmul.msk.f32.vlgmr.msra.gmra.mxu0 %vm75_vm0, %v66_v8  ;;  %157 = vmatmul.msk.f32.vlgmr.msra.gmra.mxu1 %vm75_vm0, %v66_v8 }
  0x93   :  { %v96_v12 = vpop.f32.mrf.mxu0  ;;  %v116_v13 = vpop.f32.mrf.mxu1 }
  0x94   :  { %v134_v14 = vadd.f32 %v130_v10, %v96_v12  ;;  %v135_v15 = vadd.f32 %v131_v11, %v116_v13 }
  0x96   :  { %136 = vst [vmem:[#allocation9] sm:$0xff] %v134_v14 }
  0x97   :  { %137 = vst [vmem:[#allocation9 + $0x8] sm:$0xff] %v135_v15 }
  0x98   :  { %148 = dma.vmem_to_hbm [thread:$0]  %s144_s2, 256, %s146_s30, [#allocation5]  }
  0x99   :  { %264 = dma.done.wait [#allocation5], 256  }
  0x9a   :  { %265 = vsyncadd [#allocation5], 4294967040 }
  0x9b   :  { %153 = vsyncpa [#allocation4], 1 }
  0x9c   :  { %154 = vsyncpa [#allocation7], 1 }
  0x9d   :  { %155 = vsyncpa [#allocation5], 1 }

</bundles_post_ra>
